<compile_context>
chip_gen: v6e
topology: v6e:2x2x1
jax: 0.10.0
libtpu: 0.0.40
codegen_flags: <defaults>
</compile_context>

<pallas_src>
import math

import jax
import jax.numpy as jnp
from jax.experimental import pallas as pl
from jax.experimental.pallas import tpu as pltpu


def _round_up(a: int, b: int) -> int:
    return ((a + b - 1) // b) * b


def _extract_kernel(xT_ref, w_ref, b_ref, oT_ref):
    """Fused MLP chain, feature-major.

    xT_ref: (H, TN)   activation tile, rows of the original x live in lanes
    w_ref:  (K, H, H) weights in native PyTorch (out_features, in_features), bf16
    b_ref:  (K, H, 1) biases (broadcast over lanes), f32
    oT_ref: (H, TN)   output tile
    """
    K = w_ref.shape[0]
    y = xT_ref[...]                                   # f32 (H, TN)
    for k in range(K):                                # K is static -> unrolled
        w = w_ref[k]                                  # (H_out, H_in) bf16
        acc = jnp.dot(w, y.astype(jnp.bfloat16),      # MXU, bf16 x bf16 -> f32
                      preferred_element_type=jnp.float32)
        y = acc + b_ref[k]                            # (H,1) broadcasts over lanes
        if k < K - 1:
            y = jnp.maximum(y, 0.0)
    oT_ref[...] = y.astype(oT_ref.dtype)


def extract_forward(x, weights, biases, *, tile_n=None):
    """EXTRACT forward pass with a Pallas TPU kernel.

    x:       (N, H) float32
    weights: (K, H, H) float32, PyTorch Linear layout (out_features, in_features)
    biases:  (K, H) float32
    returns: (N, H) float32, identical semantics to the torch module
             (x = relu(Linear(x)) for the first K-1 layers, Linear for the last).
    """
    N, H = x.shape
    K = weights.shape[0]
    assert weights.shape == (K, H, H) and biases.shape == (K, H)

    # Parameters: bf16 weights for the MXU (ideally pre-cast at init), bias as
    # a column so it is a 2-D lane-broadcast inside the kernel.
    w_bf16 = weights.astype(jnp.bfloat16)             # native (out, in): no transpose
    b_col = biases.astype(jnp.float32).reshape(K, H, 1)

    # Row tile: multiple of 128 (lane-dense), default 512, never over-pad tiny N.
    if tile_n is None:
        tile_n = 512
    tile_n = _round_up(max(int(tile_n), 128), 128)
    tile_n = min(tile_n, _round_up(N, 128))

    grid_n = pl.cdiv(N, tile_n)
    n_pad = grid_n * tile_n

    # Feature-major slab with zero-padded tail rows (independent columns, sliced off).
    xT = jnp.pad(x, ((0, n_pad - N), (0, 0))).T       # (H, n_pad)

    # VMEM budget: double-buffered in/out f32 tiles + resident params + headroom.
    est = 2 * (2 * H * tile_n * 4) + 2 * (K * H * H * 2 + K * H * 4)
    vmem_limit = int(min(max(4 * est, 16 << 20), 32 << 20))

    outT = pl.pallas_call(
        _extract_kernel,
        out_shape=jax.ShapeDtypeStruct((H, n_pad), x.dtype),
        grid_spec=pltpu.PrefetchScalarGridSpec(
            num_scalar_prefetch=0,
            grid=(grid_n,),
            in_specs=[
                pl.BlockSpec((H, tile_n), lambda i: (0, i)),    # activation tile
                pl.BlockSpec((K, H, H), lambda i: (0, 0, 0)),   # all weights (resident)
                pl.BlockSpec((K, H, 1), lambda i: (0, 0, 0)),   # all biases (resident)
            ],
            out_specs=pl.BlockSpec((H, tile_n), lambda i: (0, i)),
        ),
        compiler_params=pltpu.CompilerParams(
            dimension_semantics=("parallel",),   # shards row tiles across v7x TCs
            vmem_limit_bytes=vmem_limit,
        ),
    )(xT, w_bf16, b_col)

    return outT[:, :N].T                              # back to (N, H)


def extract_reference(x, weights, biases, *, use_bf16=False):
    """Pure-JAX reference matching torch semantics (optionally bf16-emulated)."""
    K = weights.shape[0]
    y = x.astype(jnp.float32)
    for k in range(K):
        if use_bf16:
            y = jax.lax.dot_general(
                y.astype(jnp.bfloat16), weights[k].astype(jnp.bfloat16),
                (((1,), (1,)), ((), ())),
                preferred_element_type=jnp.float32) + biases[k]
        else:
            y = y @ weights[k].T + biases[k]
        if k < K - 1:
            y = jnp.maximum(y, 0.0)
    return y


if __name__ == "__main__":
    K_EMod = 3
    h_dim = 32
    N = 1000          # non-multiple of the tile: exercises the padded-tail path

    key = jax.random.PRNGKey(0)
    kx, kw, kb = jax.random.split(key, 3)

    bound = 1.0 / math.sqrt(h_dim)
    x = jax.random.normal(kx, (N, h_dim), dtype=jnp.float32)
    weights = jax.random.uniform(
        kw, (K_EMod, h_dim, h_dim), minval=-bound, maxval=bound,
        dtype=jnp.float32)
    biases = jax.random.uniform(
        kb, (K_EMod, h_dim), minval=-bound, maxval=bound, dtype=jnp.float32)

    # tile_n=256 -> 4 grid steps: pipelined DMAs + both TensorCores on v7x.
    out = jax.block_until_ready(extract_forward(x, weights, biases, tile_n=256))

    ref_bf16 = extract_reference(x, weights, biases, use_bf16=True)
    ref_f32 = extract_reference(x, weights, biases, use_bf16=False)

    assert out.shape == (N, h_dim)
    # Strict check against the bf16-MXU-emulated reference.
    assert jnp.allclose(out, ref_bf16, atol=1e-3, rtol=1e-3), \
        "mismatch vs bf16 reference"
    # Loose sanity check against the fp32 torch-semantics reference.
    assert jnp.allclose(out, ref_f32, atol=5e-2, rtol=5e-2), \
        "mismatch vs fp32 reference"

    print("KERNEL_OK")
</pallas_src>

<mosaic_0001>
module attributes {stable_mosaic.version = 11 : i64} {
  func.func @_extract_kernel(%arg0: i32, %arg1: memref<32x256xf32, #tpu.memory_space<vmem>>, %arg2: memref<3x32x32xbf16, #tpu.memory_space<vmem>>, %arg3: memref<3x32x1xf32, #tpu.memory_space<vmem>>, %arg4: memref<32x256xf32, #tpu.memory_space<vmem>>) attributes {dimension_semantics = [#tpu.dimension_semantics<parallel>], iteration_bounds = array<i64: 4>, scalar_prefetch = 0 : i64, scratch_operands = 0 : i64, tpu.core_type = #tpu.core_type<tc>, window_params = [{transform_indices = @transform_0, window_bounds = array<i64: 32, 256>}, {pipeline_mode = #tpu.pipeline_mode<synchronous>, transform_indices = @transform_1, window_bounds = array<i64: 3, 32, 32>}, {pipeline_mode = #tpu.pipeline_mode<synchronous>, transform_indices = @transform_2, window_bounds = array<i64: 3, 32, 1>}, {transform_indices = @transform_3, window_bounds = array<i64: 32, 256>}]} {
    %c0 = arith.constant 0 : index
    %c0_0 = arith.constant 0 : index
    %0 = vector.load %arg1[%c0, %c0_0] : memref<32x256xf32, #tpu.memory_space<vmem>>, vector<32x256xf32>
    %c0_1 = arith.constant 0 : index
    %c0_2 = arith.constant 0 : index
    %c0_3 = arith.constant 0 : index
    %1 = vector.load %arg2[%c0_1, %c0_2, %c0_3] : memref<3x32x32xbf16, #tpu.memory_space<vmem>>, vector<1x32x32xbf16>
    %2 = vector.shape_cast %1 : vector<1x32x32xbf16> to vector<32x32xbf16>
    %3 = arith.truncf %0 : vector<32x256xf32> to vector<32x256xbf16>
    %cst = arith.constant dense<0.000000e+00> : vector<32x256xf32>
    %4 = tpu.matmul %2, %3, %cst {dimension_numbers = #tpu.dot_dimension_numbers<[1], [0], [0], [1], [0, 0, 1, 1], [], []>} : vector<32x32xbf16>, vector<32x256xbf16>, vector<32x256xf32> -> vector<32x256xf32>
    %c0_4 = arith.constant 0 : index
    %c0_5 = arith.constant 0 : index
    %c0_6 = arith.constant 0 : index
    %5 = vector.load %arg3[%c0_4, %c0_5, %c0_6] : memref<3x32x1xf32, #tpu.memory_space<vmem>>, vector<1x32x1xf32>
    %6 = vector.shape_cast %5 : vector<1x32x1xf32> to vector<32x1xf32>
    %7 = vector.broadcast %6 : vector<32x1xf32> to vector<32x256xf32>
    %8 = arith.addf %4, %7 : vector<32x256xf32>
    %cst_7 = arith.constant 0.000000e+00 : f32
    %9 = vector.broadcast %cst_7 : f32 to vector<32x256xf32>
    %10 = arith.maximumf %8, %9 : vector<32x256xf32>
    %c1 = arith.constant 1 : index
    %c0_8 = arith.constant 0 : index
    %c0_9 = arith.constant 0 : index
    %11 = vector.load %arg2[%c1, %c0_8, %c0_9] : memref<3x32x32xbf16, #tpu.memory_space<vmem>>, vector<1x32x32xbf16>
    %12 = vector.shape_cast %11 : vector<1x32x32xbf16> to vector<32x32xbf16>
    %13 = arith.truncf %10 : vector<32x256xf32> to vector<32x256xbf16>
    %cst_10 = arith.constant dense<0.000000e+00> : vector<32x256xf32>
    %14 = tpu.matmul %12, %13, %cst_10 {dimension_numbers = #tpu.dot_dimension_numbers<[1], [0], [0], [1], [0, 0, 1, 1], [], []>} : vector<32x32xbf16>, vector<32x256xbf16>, vector<32x256xf32> -> vector<32x256xf32>
    %c1_11 = arith.constant 1 : index
    %c0_12 = arith.constant 0 : index
    %c0_13 = arith.constant 0 : index
    %15 = vector.load %arg3[%c1_11, %c0_12, %c0_13] : memref<3x32x1xf32, #tpu.memory_space<vmem>>, vector<1x32x1xf32>
    %16 = vector.shape_cast %15 : vector<1x32x1xf32> to vector<32x1xf32>
    %17 = vector.broadcast %16 : vector<32x1xf32> to vector<32x256xf32>
    %18 = arith.addf %14, %17 : vector<32x256xf32>
    %cst_14 = arith.constant 0.000000e+00 : f32
    %19 = vector.broadcast %cst_14 : f32 to vector<32x256xf32>
    %20 = arith.maximumf %18, %19 : vector<32x256xf32>
    %c2 = arith.constant 2 : index
    %c0_15 = arith.constant 0 : index
    %c0_16 = arith.constant 0 : index
    %21 = vector.load %arg2[%c2, %c0_15, %c0_16] : memref<3x32x32xbf16, #tpu.memory_space<vmem>>, vector<1x32x32xbf16>
    %22 = vector.shape_cast %21 : vector<1x32x32xbf16> to vector<32x32xbf16>
    %23 = arith.truncf %20 : vector<32x256xf32> to vector<32x256xbf16>
    %cst_17 = arith.constant dense<0.000000e+00> : vector<32x256xf32>
    %24 = tpu.matmul %22, %23, %cst_17 {dimension_numbers = #tpu.dot_dimension_numbers<[1], [0], [0], [1], [0, 0, 1, 1], [], []>} : vector<32x32xbf16>, vector<32x256xbf16>, vector<32x256xf32> -> vector<32x256xf32>
    %c2_18 = arith.constant 2 : index
    %c0_19 = arith.constant 0 : index
    %c0_20 = arith.constant 0 : index
    %25 = vector.load %arg3[%c2_18, %c0_19, %c0_20] : memref<3x32x1xf32, #tpu.memory_space<vmem>>, vector<1x32x1xf32>
    %26 = vector.shape_cast %25 : vector<1x32x1xf32> to vector<32x1xf32>
    %27 = vector.broadcast %26 : vector<32x1xf32> to vector<32x256xf32>
    %28 = arith.addf %24, %27 : vector<32x256xf32>
    %c0_21 = arith.constant 0 : index
    %c0_22 = arith.constant 0 : index
    %29 = vector.load %arg4[%c0_21, %c0_22] : memref<32x256xf32, #tpu.memory_space<vmem>>, vector<32x256xf32>
    tpu.vector_store %arg4[%c0_21, %c0_22], %28 {strides = array<i32>} : memref<32x256xf32, #tpu.memory_space<vmem>>, vector<32x256xf32>,
    return
  }
  func.func @transform_0(%arg0: i32) -> (i32, i32) {
    %c0_i32 = arith.constant 0 : i32
    %c0_i32_0 = arith.constant 0 : i32
    return %c0_i32, %arg0 : i32, i32
  }
  func.func @transform_1(%arg0: i32) -> (i32, i32, i32) {
    %c0_i32 = arith.constant 0 : i32
    %c0_i32_0 = arith.constant 0 : i32
    %c0_i32_1 = arith.constant 0 : i32
    %c0_i32_2 = arith.constant 0 : i32
    return %c0_i32, %c0_i32_0, %c0_i32_1 : i32, i32, i32
  }
  func.func @transform_2(%arg0: i32) -> (i32, i32, i32) {
    %c0_i32 = arith.constant 0 : i32
    %c0_i32_0 = arith.constant 0 : i32
    %c0_i32_1 = arith.constant 0 : i32
    %c0_i32_2 = arith.constant 0 : i32
    return %c0_i32, %c0_i32_0, %c0_i32_1 : i32, i32, i32
  }
  func.func @transform_3(%arg0: i32) -> (i32, i32) {
    %c0_i32 = arith.constant 0 : i32
    %c0_i32_0 = arith.constant 0 : i32
    return %c0_i32, %arg0 : i32, i32
  }
}

</mosaic_0001>

<bundles_post_ra>
// kernel: tpu_custom_call.1
= control target key start
LH: loop header
LB: loop body
LE: loop exit
PB: predicated region body
PF: predicated region fallthrough
CT: control target
= control target key end

     0   :  { %8 = vsyncpa [#allocation3], 0  ;;  %s1077_s0 = inlined_call_operand.hbm [shape: f32[32,1024], index: 0, kind: input, shape index: {}]   ;;  %s1078_s1 = inlined_call_operand.vmem [shape: bf16[3,32,32], index: 1, kind: input, shape index: {}]   ;;  %s1079_s2 = inlined_call_operand.vmem [shape: f32[3,32,1], index: 2, kind: input, shape index: {}]   ;;  %s1080_s3 = inlined_call_operand.hbm [shape: f32[32,1024], index: 3, kind: output, shape index: {}]  }
   0x1   :  { %10 = vsyncpa [#allocation3 + $0x1], 0 }
   0x2   :  { %11 = vsyncpa [#allocation4], 0 }
   0x3   :  { %13 = vsyncpa [#allocation4 + $0x1], 0  ;;  %s851_s12 = smov 0   ;;  %s853_s13 = smov 0  }
   0x4   :  { %s855_s14 = smov 0   ;;  %s857_s15 = smov 0  }
   0x5 LB: > { %s872_s16 = sadd.s32 4294967295, %s820_s15   ;;  %s619_s17 = sadd.s32 4294967294, %s820_s15   ;;  %s820_s15 = sphi %s857_s15, %s1095_s15   ;;  %s816_s14 = sphi %s855_s14, %s1094_s14   ;;  %s812_s13 = sphi %s853_s13, %s1093_s13   ;;  %s808_s12 = sphi %s851_s12, %s1092_s12  }
   0x6   : > { %s876_s18 = sadd.s32 1, %s820_s15   ;;  %s26_s19 = sadd.s32 1, %s816_s14 }
   0x7   : > { %s23_s20 = ssub.s32 %s820_s15, %s876_s18  ;;  %p33_p0 = scmp.ne.s32.totalorder %s816_s14, %s812_s13 }
   0x8   : > { %p24_p1 = scmp.eq.s32.totalorder %s23_s20, 0  ;;  %p34_p2 = scmp.eq.s32.totalorder %s820_s15, 0 }
   0x9   : > { %p39_p3 = scmp.ne.s32.totalorder %s812_s13, %s808_s12  ;;  %p40_p4 = scmp.eq.s32.totalorder %s872_s16, 0 }
   0xa   : > { %s888_s21 = scalar_select %p24_p1, %s816_s14, %s26_s19  }
   0xb   : > { %p890_p5 = por %p34_p2, %p33_p0  ;;  %p894_p6 = por %p40_p4, %p39_p3 }
   0xc   : > { %p105_p7 = scmp.eq.s32.totalorder %s872_s16, 3  ;;  %p111_p8 = scmp.eq.s32.totalorder %s619_s17, 3 }
   0xd   : > { %s1084_s23 = scalar_select %p894_p6, 1, 0 }
   0xe   : > { %p679_p9 = scmp.lt.s32.totalorder %s820_s15, 4  ;;  %p900_p10 = por %p105_p7, %p33_p0 }
   0xf   : > { %p904_p11 = por %p111_p8, %p39_p3  ;;  %s137_s26 = sand.u32 1, %s816_s14  }
  0x10   : > { %s1085_s24 = scalar_select %p900_p10, 1, 0 }
  0x11   : > { %s1086_s25 = scalar_select %p904_p11, 1, 0 }
  0x12   : > { %s661_s27 = sshll.u32 %s820_s15, 8  ;;  %s622_s28 = sshll.u32 %s137_s26, 6 }
  0x13   : > { %s913_s4 = scalar_lea.hbm %s1077_s0, %s661_s27  ;;  %s141_s5 = scalar_lea.vmem [#allocation2], %s622_s28 }
  0x14   : > { %s148_s6 = sshll.u32 %s141_s5, 4  ;;  %p917_p12 = pnand %p679_p9, %p890_p5  ;;  %s921_s6 = int_to_ptr.vmem [resolvable:$true] %s148_s6 }
  0x15   : > { %s924_s8 = scalar_lea.sflag [#allocation3], %s137_s26  ;;  %s728_s9 = scalar_lea.hbm %s913_s4, 1024 }
  0x16   : > { %p729_p0 = scmp.ne.s32.totalorder %s913_s4, %s728_s9  ;;  %p730_p1 = pneg %p917_p12 }
  0x17   : > { %s733_s17 = scalar_lea.hbm %s1077_s0, 4096  ;;  %p734_p4 = scmp.lt.s32.totalorder %s913_s4, %s1077_s0 }
  0x18   : > { %p731_p2 = pnand %p730_p1, %p729_p0  ;;  %p735_p5 = scmp.lt.s32.totalorder %s733_s17, %s728_s9 }
  0x1a   : > { %p732_p3 = pneg %p731_p2  ;;  %p736_p7 = por %p735_p5, %p734_p4 }
  0x1c   : > { %p737_p8 = pnand %p736_p7, %p732_p3 }
  0x1e   : > { %740 = shalt.err (!%p737_p8)
}
  0x1f   : > { %s741_s22 = scalar_lea.vmem %s921_s6, 1024  ;;  %s822_s26 = smov [#allocation2]  }
  0x20   : > { %p742_p9 = scmp.ne.s32.totalorder %s921_s6, %s741_s22  ;;  %s746_s27 = sshll.u32 %s822_s26, 4  ;;  %s747_s27 = int_to_ptr.vmem [resolvable:$false] %s746_s27 }
  0x21   : > { %s748_s28 = scalar_lea.vmem %s747_s27, 2048  ;;  %p749_p2 = scmp.lt.s32.totalorder %s921_s6, %s747_s27 }
  0x22   : > { %p744_p13 = pnand %p742_p9, %p730_p1  ;;  %p750_p11 = scmp.lt.s32.totalorder %s748_s28, %s741_s22 }
  0x24   : > { %p745_p0 = pneg %p744_p13  ;;  %p751_p10 = por %p750_p11, %p749_p2 }
  0x26   : > { %p752_p6 = pnand %p751_p10, %p745_p0 }
  0x28   : > { %755 = shalt.err (!%p752_p6)
}
  0x29   : > { %s823_s29 = smov 1024   ;;  %s824_s30 = smov 256  }
  0x2a   : > { %s825_s5 = smov 16   ;;  %p156_p13 = scmp.lt.s32.totalorder %s820_s15, 5 }
  0x2b   : > { %674 = dma.hbm_to_vmem [thread:$0]  (!%p917_p12), %s913_s4, 1024, %s921_s6, %s924_s8, %s823_s29, %s824_s30, %s825_s5  }
  0x2c   : > { %p1088_p1 = scmp.ge.s32.totalorder %s820_s15, 1 }
  0x2e   : > { %p157_p3 = pnand %p1088_p1, %p156_p13 }
  0x2f   : > { %s949_s9 = sand.u32 (!%p157_p3), 1, %s812_s13   ;;  %p1089_p6 = scmp.ne.s32.totalorder (!%p157_p3), %s1084_s23, 0 }
  0x30   : > { %160 = sbr.rel (%p157_p3) target bundleno = 723 (0x2d3), region = 32  ;;  %s626_s10 = sshll.u32 (!%p157_p3), %s949_s9, 6 }
  0x31   : > { %s163_s11 = scalar_lea.sflag (!%p157_p3), [#allocation3], %s949_s9  ;;  %s166_s17 = scalar_lea.vmem (!%p157_p3), [#allocation2], %s626_s10 }
  0x35   : > { %799 = dma.done.wait (%p1089_p6), %s163_s11, 1024  }
  0x36   : > { %801 = vsyncadd (%p1089_p6), %s163_s11, 4294966272  ;;  %v826_v0 = vmov 0   ;;  %v197_v1 = vld [vmem:[%s166_s17 + $0x28] sm:$0xff]  ;;  %v199_v2 = vld [vmem:[%s166_s17 + $0x38] sm:$0xff]  ;;  %vm242_vm0 = vcmask 261120   ;;  %s188_s8 = scalar_lea.vmem [#allocation5], %s626_s10 }
  0x37   : > { %281 = vmatprep.mubr.bf16.mxu0 %v826_v0  ;;  %291 = vmatprep.mubr.bf16.mxu1 %v826_v0  ;;  %v196_v3 = vld [vmem:[%s166_s17 + $0x20] sm:$0xff]  ;;  %v207_v4 = vpack.c.bf16 %v199_v2, %v197_v1  ;;  %v198_v5 = vld [vmem:[%s166_s17 + $0x30] sm:$0xff]  ;;  %v193_v6 = vld [vmem:[%s166_s17 + $0x8] sm:$0xff]  ;;  %s546_s19 = sshll.u32 %s188_s8, 4  ;;  %s662_s10 = sshll.u32 %s872_s16, 8  ;;  %s1030_s19 = int_to_ptr.vmem [resolvable:$true] %s546_s19 }
  0x38   : > { %720 = vset.pattern.permute.xlu0 %v826_v0  ;;  %721 = vset.pattern.permute.xlu1 %v826_v0  ;;  %v195_v7 = vld [vmem:[%s166_s17 + $0x18] sm:$0xff]  ;;  %v206_v8 = vpack.c.bf16 %v198_v5, %v196_v3  ;;  %v192_v10 = vld [vmem:[%s166_s17] sm:$0xff]  ;;  %v194_v11 = vld [vmem:[%s166_s17 + $0x10] sm:$0xff]  ;;  %s1035_s26 = scalar_lea.hbm %s1080_s3, %s662_s10  ;;  %s533_s27 = scalar_lea.sflag [#allocation4], %s949_s9 }
  0x39   : > { %v205_v9 = vpack.c.bf16 %v195_v7, %v193_v6  ;;  %261 = vmatprep.subr.bf16.mxu0 %v207_v4  ;;  %663 = vmatprep.subr.bf16.mxu1 %v207_v4  ;;  %v204_v12 = vpack.c.bf16 %v194_v11, %v192_v10  ;;  %v210_v13 = vld [vmem:[%s1079_s2 + $0x10] sm:$0xff]  ;;  %v208_v14 = vld [vmem:[%s1079_s2] sm:$0xff]  ;;  %v723_v16 = vld [vmem:[%s1078_s1 + $0x8] sm:$0xff]   ;;  %s756_s16 = scalar_lea.vmem %s1030_s19, 1024  ;;  %p1090_p11 = scmp.ne.s32.totalorder %s1085_s24, 0 }
  0x3a   : > { %262 = vmatpush1.bf16.msra.mxu0 %v206_v8  ;;  %665 = vmatpush1.bf16.msra.mxu1 %v206_v8  ;;  %v722_v15 = vld [vmem:[%s1078_s1] sm:$0xff]   ;;  %v211_v17 = vld [vmem:[%s1079_s2 + $0x18] sm:$0xff]  ;;  %v209_v18 = vld [vmem:[%s1079_s2 + $0x8] sm:$0xff]  ;;  %p757_p10 = scmp.ne.s32.totalorder %s1030_s19, %s756_s16  ;;  %s827_s28 = smov [#allocation5]  }
  0x3b   : > { %263 = vmatprep.subr.bf16.mxu0 %v205_v9  ;;  %664 = vmatprep.subr.bf16.mxu1 %v205_v9  ;;  %v638_v19 = vld [vmem:[%s1079_s2 + $0x30] sm:$0xff]  ;;  %v639_v20 = vld [vmem:[%s1079_s2 + $0x38] sm:$0xff]  ;;  %v636_v21 = vld [vmem:[%s1079_s2 + $0x20] sm:$0xff]  ;;  %s760_s29 = sshll.u32 %s827_s28, 4  ;;  %s761_s29 = int_to_ptr.vmem [resolvable:$false] %s760_s29 }
  0x3c   : > { %224 = vperm.xlu0 %720, %v210_v13   ;;  %214 = vperm.xlu1 %721, %v208_v14   ;;  %v637_v22 = vld [vmem:[%s1079_s2 + $0x28] sm:$0xff]  ;;  %v648_v23 = vld [vmem:[%s1079_s2 + $0x40] sm:$0xff]  ;;  %v650_v25 = vld [vmem:[%s1079_s2 + $0x50] sm:$0xff]  ;;  %p758_p12 = pnand %p757_p10, %p1090_p11  ;;  %s762_s30 = scalar_lea.vmem %s761_s29, 2048 }
  0x3d   : > { %v649_v24 = vld [vmem:[%s1079_s2 + $0x48] sm:$0xff]  ;;  %v651_v26 = vld [vmem:[%s1079_s2 + $0x58] sm:$0xff]  ;;  %v724_v59 = vld [vmem:[%s1078_s1 + $0x10] sm:$0xff]   ;;  %p763_p5 = scmp.lt.s32.totalorder %s1030_s19, %s761_s29  ;;  %p764_p7 = scmp.lt.s32.totalorder %s762_s30, %s756_s16 }
  0x3e   : > { %264 = vmatpush1.bf16.msra.mxu0 %v204_v12  ;;  %666 = vmatpush1.bf16.msra.mxu1 %v204_v12  ;;  %v725_v60 = vld [vmem:[%s1078_s1 + $0x18] sm:$0xff]   ;;  %p759_p4 = pneg %p758_p12 }
  0x3f   : > { %p765_p8 = por %p764_p7, %p763_p5 }
  0x40   : > { %229 = vperm.xlu0 %720, %v211_v17   ;;  %219 = vperm.xlu1 %721, %v209_v18  }
  0x41   : > { %630 = vmatmul.mubr.msk.bf16.vlgmr.msra.gmra.mxu0 %vm242_vm0, %v722_v15  ;;  %631 = vmatmul.mubr.msk.bf16.vlgmr.msra.gmra.mxu1 %vm242_vm0, %v723_v16  ;;  %p766_p9 = pnand %p765_p8, %p759_p4 }
  0x42   : > { %392 = vmatprep.mubr.bf16.mxu1 %v826_v0  ;;  %503 = vmatprep.mubr.bf16.mxu0 %v826_v0 }
  0x44   : > { %336 = vperm.xlu0 %720, %v638_v19   ;;  %341 = vperm.xlu1 %721, %v639_v20  }
  0x48   : > { %326 = vperm.xlu0 %720, %v636_v21   ;;  %331 = vperm.xlu1 %721, %v637_v22  }
  0x4c   : > { %437 = vperm.xlu0 %720, %v648_v23   ;;  %442 = vperm.xlu1 %721, %v649_v24  }
  0x50   : > { %447 = vperm.xlu0 %720, %v650_v25   ;;  %452 = vperm.xlu1 %721, %v651_v26  }
  0xb7   : > { %v225_v27 = vpop.permute.xlu0 %224  ;;  %v215_v28 = vpop.permute.xlu1 %214 }
  0xbb   : > { %v230_v33 = vpop.permute.xlu0 %229  ;;  %v220_v36 = vpop.permute.xlu1 %219 }
  0xbf   : > { %v342_v1 = vpop.permute.xlu1 %341  ;;  %v337_v3 = vpop.permute.xlu0 %336 }
  0xc3   : > { %v332_v6 = vpop.permute.xlu1 %331  ;;  %v327_v11 = vpop.permute.xlu0 %326 }
 0x101   : > { %v283_v29 = vpop.f32.mrf.mxu0  ;;  %v293_v30 = vpop.f32.mrf.mxu1 }
 0x102   : > { %v294_v39 = vadd.f32 %v293_v30, %v225_v27  ;;  %v284_v45 = vadd.f32 %v283_v29, %v215_v28  ;;  %v726_v30 = vld [vmem:[%s1078_s1 + $0x20] sm:$0xff]  }
 0x103   : > { %v285_v31 = vpop.f32.mrf.mxu0  ;;  %v295_v32 = vpop.f32.mrf.mxu1 }
 0x104   : > { %v296_v37 = vadd.f32 %v295_v32, %v225_v27  ;;  %v286_v42 = vadd.f32 %v285_v31, %v215_v28  ;;  %v306_v51 = vmax.f32 %v294_v39, 0.0  ;;  %v302_v54 = vmax.f32 %v284_v45, 0.0  ;;  %v727_v31 = vld [vmem:[%s1078_s1 + $0x28] sm:$0xff]   ;;  %v438_v32 = vpop.permute.xlu0 %437 }
 0x105   : > { %v287_v34 = vpop.f32.mrf.mxu0  ;;  %v297_v35 = vpop.f32.mrf.mxu1 }
 0x106   : > { %v298_v38 = vadd.f32 %v297_v35, %v230_v33  ;;  %v288_v46 = vadd.f32 %v287_v34, %v220_v36  ;;  %v307_v48 = vmax.f32 %v296_v37, 0.0  ;;  %v303_v52 = vmax.f32 %v286_v42, 0.0  ;;  %v443_v37 = vpop.permute.xlu1 %442 }
 0x107   : > { %v289_v40 = vpop.f32.mrf.mxu0  ;;  %v299_v41 = vpop.f32.mrf.mxu1 }
 0x108   : > { %v290_v43 = vadd.f32 %v289_v40, %v220_v36  ;;  %v300_v44 = vadd.f32 %v299_v41, %v230_v33  ;;  %v308_v47 = vmax.f32 %v298_v38, 0.0  ;;  %v304_v55 = vmax.f32 %v288_v46, 0.0  ;;  %v448_v41 = vpop.permute.xlu0 %447 }
 0x10a   : > { %v305_v49 = vmax.f32 %v290_v43, 0.0  ;;  %v309_v50 = vmax.f32 %v300_v44, 0.0  ;;  %v317_v56 = vpack.c.bf16 %v308_v47, %v306_v51  ;;  %v315_v58 = vpack.c.bf16 %v304_v55, %v302_v54  ;;  %v453_v46 = vpop.permute.xlu1 %452 }
 0x10c   : > { %v318_v53 = vpack.c.bf16 %v309_v50, %v307_v48  ;;  %v316_v57 = vpack.c.bf16 %v305_v49, %v303_v52 }
 0x10e   : > { %372 = vmatprep.subr.bf16.mxu1 %v318_v53 }
 0x10f   : > { %373 = vmatpush1.bf16.msra.mxu1 %v317_v56 }
 0x110   : > { %374 = vmatprep.subr.bf16.mxu1 %v316_v57 }
 0x113   : > { %375 = vmatpush1.bf16.msra.mxu1 %v315_v58 }
 0x116   : > { %642 = vmatmul.mubr.msk.bf16.vlgmr.msra.gmra.mxu1 %vm242_vm0, %v724_v59 }
 0x117   : > { %402 = vmatprep.mubr.bf16.mxu1 %v826_v0 }
 0x11e   : > { %643 = vmatmul.mubr.msk.bf16.gmra.mxu1 %vm242_vm0, %v725_v60 }
 0x1d6   : > { %v394_v61 = vpop.f32.mrf.mxu1 }
 0x1d7   : > { %v395_v21 = vadd.f32 %v394_v61, %v327_v11 }
 0x1d8   : > { %v396_v62 = vpop.f32.mrf.mxu1 }
 0x1d9   : > { %v397_v14 = vadd.f32 %v396_v62, %v327_v11  ;;  %v413_v28 = vmax.f32 %v395_v21, 0.0 }
 0x1da   : > { %v398_v63 = vpop.f32.mrf.mxu1 }
 0x1db   : > { %v399_v16 = vadd.f32 %v398_v63, %v332_v6  ;;  %v414_v23 = vmax.f32 %v397_v14, 0.0 }
 0x1dc   : > { %v400_v2 = vpop.f32.mrf.mxu1 }
 0x1dd   : > { %v401_v8 = vadd.f32 %v400_v2, %v332_v6  ;;  %v415_v25 = vmax.f32 %v399_v16, 0.0 }
 0x1de   : > { %v404_v4 = vpop.f32.mrf.mxu1 }
 0x1df   : > { %v405_v12 = vadd.f32 %v404_v4, %v337_v3  ;;  %v416_v18 = vmax.f32 %v401_v8, 0.0  ;;  %v426_v29 = vpack.c.bf16 %v415_v25, %v413_v28 }
 0x1e0   : > { %v406_v5 = vpop.f32.mrf.mxu1 }
 0x1e1   : > { %v407_v9 = vadd.f32 %v406_v5, %v337_v3  ;;  %v417_v22 = vmax.f32 %v405_v12, 0.0  ;;  %v427_v27 = vpack.c.bf16 %v416_v18, %v414_v23 }
 0x1e2   : > { %v408_v7 = vpop.f32.mrf.mxu1 }
 0x1e3   : > { %v409_v10 = vadd.f32 %v408_v7, %v342_v1  ;;  %v418_v19 = vmax.f32 %v407_v9, 0.0 }
 0x1e4   : > { %v410_v13 = vpop.f32.mrf.mxu1 }
 0x1e5   : > { %v411_v15 = vadd.f32 %v410_v13, %v342_v1  ;;  %v419_v17 = vmax.f32 %v409_v10, 0.0 }
 0x1e7   : > { %v420_v20 = vmax.f32 %v411_v15, 0.0  ;;  %v428_v26 = vpack.c.bf16 %v419_v17, %v417_v22 }
 0x1e9   : > { %v429_v24 = vpack.c.bf16 %v420_v20, %v418_v19 }
 0x1eb   : > { %483 = vmatprep.subr.bf16.mxu0 %v429_v24 }
 0x1ec   : > { %484 = vmatpush1.bf16.msra.mxu0 %v428_v26 }
 0x1ed   : > { %485 = vmatprep.subr.bf16.mxu0 %v427_v27 }
 0x1f0   : > { %486 = vmatpush1.bf16.msra.mxu0 %v426_v29 }
 0x1f3   : > { %654 = vmatmul.mubr.msk.bf16.vlgmr.msra.gmra.mxu0 %vm242_vm0, %v726_v30 }
 0x1f4   : > { %513 = vmatprep.mubr.bf16.mxu0 %v826_v0 }
 0x1fb   : > { %655 = vmatmul.mubr.msk.bf16.gmra.mxu0 %vm242_vm0, %v727_v31 }
 0x2b3   : > { %v505_v33 = vpop.f32.mrf.mxu0 }
 0x2b4   : > { %v506_v34 = vadd.f32 %v505_v33, %v438_v32 }
 0x2b5   : > { %v507_v35 = vpop.f32.mrf.mxu0 }
 0x2b6   : > { %524 = vst [vmem:[%s188_s8] sm:$0xff] %v506_v34  ;;  %v508_v36 = vadd.f32 %v507_v35, %v438_v32 }
 0x2b7   : > { %v509_v38 = vpop.f32.mrf.mxu0 }
 0x2b8   : > { %525 = vst [vmem:[%s188_s8 + $0x8] sm:$0xff] %v508_v36  ;;  %v510_v39 = vadd.f32 %v509_v38, %v443_v37 }
 0x2b9   : > { %v511_v0 = vpop.f32.mrf.mxu0 }
 0x2ba   : > { %526 = vst [vmem:[%s188_s8 + $0x10] sm:$0xff] %v510_v39  ;;  %v512_v40 = vadd.f32 %v511_v0, %v443_v37 }
 0x2bb   : > { %v515_v42 = vpop.f32.mrf.mxu0 }
 0x2bc   : > { %527 = vst [vmem:[%s188_s8 + $0x18] sm:$0xff] %v512_v40  ;;  %v516_v43 = vadd.f32 %v515_v42, %v448_v41 }
 0x2bd   : > { %v517_v44 = vpop.f32.mrf.mxu0 }
 0x2be   : > { %528 = vst [vmem:[%s188_s8 + $0x20] sm:$0xff] %v516_v43  ;;  %v518_v45 = vadd.f32 %v517_v44, %v448_v41 }
 0x2bf   : > { %v519_v47 = vpop.f32.mrf.mxu0 }
 0x2c0   : > { %529 = vst [vmem:[%s188_s8 + $0x28] sm:$0xff] %v518_v45  ;;  %v520_v48 = vadd.f32 %v519_v47, %v453_v46 }
 0x2c1   : > { %v521_v49 = vpop.f32.mrf.mxu0 }
 0x2c2   : > { %530 = vst [vmem:[%s188_s8 + $0x30] sm:$0xff] %v520_v48  ;;  %v522_v50 = vadd.f32 %v521_v49, %v453_v46 }
 0x2c4   : > { %531 = vst [vmem:[%s188_s8 + $0x38] sm:$0xff] %v522_v50 }
 0x2c5   : > { %769 = shalt.err (!%p766_p9)
}
 0x2c6   : > { %s770_s5 = scalar_lea.hbm %s1035_s26, 1024  ;;  %s774_s23 = scalar_lea.hbm %s1080_s3, 4096 }
 0x2c7   : > { %p771_p0 = scmp.ne.s32.totalorder %s1035_s26, %s770_s5  ;;  %p775_p1 = scmp.lt.s32.totalorder %s1035_s26, %s1080_s3 }
 0x2c8   : > { %p776_p3 = scmp.lt.s32.totalorder %s774_s23, %s770_s5 }
 0x2c9   : > { %p772_p2 = pnand %p771_p0, %p1090_p11 }
 0x2ca   : > { %p777_p6 = por %p776_p3, %p775_p1 }
 0x2cb   : > { %p773_p13 = pneg %p772_p2 }
 0x2cd   : > { %p778_p10 = pnand %p777_p6, %p773_p13 }
 0x2cf   : > { %781 = shalt.err (!%p778_p10)
}
 0x2d0   : > { %s828_s7 = smov 256   ;;  %s829_s8 = smov 1024  }
 0x2d1   : > { %s830_s10 = smov 16  }
 0x2d2   : > { %669 = dma.vmem_to_hbm [thread:$0]  (%p1090_p11), %s1030_s19, 1024, %s1035_s26, %s533_s27, %s828_s7, %s829_s8, %s830_s10  }
 0x2d3 PF: > { %p680_p12 = scmp.ge.s32.totalorder %s820_s15, 2  ;;  %s561_s20 = sand.u32 1, %s808_s12  }
 0x2d4   : > { %p1091_p4 = scmp.ne.s32.totalorder %s1086_s25, 0  ;;  %s562_s22 = scalar_lea.sflag [#allocation4], %s561_s20 }
 0x2d6   : > { %p676_p5 = pnand %p680_p12, %p1091_p4 }
 0x2d8   : > { %p677_p7 = pneg %p676_p5 }
 0x2da   : > { %803 = dma.done.wait (%p677_p7), %s562_s22, 1024  }
 0x2db   : > { %805 = vsyncadd (%p677_p7), %s562_s22, 4294966272  ;;  %p16_p8 = scmp.ge.s32.totalorder %s876_s18, 6   ;;  %s1092_s12 = smov %s812_s13 }
 0x2dc   : > { %s1093_s13 = smov %s816_s14  ;;  %s1094_s14 = smov %s888_s21 }
 0x2dd   : > { %s1095_s15 = smov %s876_s18  ;;  %18 = sbr.rel (!%p16_p8) target bundleno = 5 (0x5), region = 81 }
 0x2e2   :  { %567 = vsyncpa [#allocation3], 1 }
 0x2e3   :  { %569 = vsyncpa [#allocation3 + $0x1], 1 }
 0x2e4   :  { %570 = vsyncpa [#allocation4], 1 }
 0x2e5   :  { %572 = vsyncpa [#allocation4 + $0x1], 1 }

</bundles_post_ra>
